<compile_context>
chip_gen: v6e
topology: v6e:2x2x1
jax: 0.10.0
libtpu: 0.0.40
codegen_flags: <defaults>
</compile_context>

<pallas_src>
import functools

import jax
import jax.numpy as jnp
from jax.experimental import pallas as pl
from jax.experimental.pallas import tpu as pltpu


LOG_STD_MIN = -20.0
LOG_STD_MAX = 2.0


def _round_up(x: int, m: int) -> int:
    return ((x + m - 1) // m) * m


def _choose_batch_tile(B: int) -> int:
    """Rows per grid step.  Small batches: one full-dim block (always legal).
    Large batches: >=2 steps (v7x megacore), <=1024 rows/tile, multiple of 16."""
    if B <= 256:
        return B
    n_steps = max(2, pl.cdiv(B, 1024))
    return _round_up(pl.cdiv(B, n_steps), 16)


def gaussian_policy_kernel(
    x_ref,    # (TB, S)      f32   state tile (cast to bf16 in-kernel)
    w1_ref,   # (S, Hp)      bf16
    b1_ref,   # (1, Hp)      f32
    w2_ref,   # (Hp, Hp)     bf16
    b2_ref,   # (1, Hp)      f32
    wh_ref,   # (Hp, 2*Ap)   bf16  fused [mean | log_std] head weights (padded)
    bh_ref,   # (1, 2*Ap)    f32   fused head bias (padded)
    lo_ref,   # (1, 2*Ap)    f32   per-column clamp lower bound (-inf / LOG_STD_MIN)
    hi_ref,   # (1, 2*Ap)    f32   per-column clamp upper bound (+inf / LOG_STD_MAX)
    out_ref,  # (TB, 2*Ap)   f32   fused [mean | log_std] output slab
):
    x = x_ref[...].astype(jnp.bfloat16)

    # hidden layer 1: relu(x @ W1 + b1)   (bf16 MXU inputs, f32 accumulate)
    h1 = jnp.dot(x, w1_ref[...], preferred_element_type=jnp.float32)
    h1 = jnp.maximum(h1 + b1_ref[...], 0.0)

    # hidden layer 2: relu(h1 @ W2 + b2)
    h2 = jnp.dot(h1.astype(jnp.bfloat16), w2_ref[...],
                 preferred_element_type=jnp.float32)
    h2 = jnp.maximum(h2 + b2_ref[...], 0.0)

    # fused heads: one matmul produces [mean | pad | log_std | pad]
    heads = jnp.dot(h2.astype(jnp.bfloat16), wh_ref[...],
                    preferred_element_type=jnp.float32)
    heads = heads + bh_ref[...]

    # per-column clamp: mean columns get (-inf, +inf), log_std columns get
    # (LOG_STD_MIN, LOG_STD_MAX).  Pure add/max/min epilogue, fully static.
    out_ref[...] = jnp.minimum(jnp.maximum(heads, lo_ref[...]), hi_ref[...])


def prepare_params(params):
    """One-time param prep: transpose to (in, out), pad hidden/head dims to
    128 multiples, fuse heads, cast weights to bf16, build clamp vectors."""
    w1 = params["w1"].T          # (S, H)
    w2 = params["w2"].T          # (H, H)
    mean_w = params["mean_w"].T  # (H, A)
    lstd_w = params["log_std_w"].T
    S, H = w1.shape
    A = mean_w.shape[1]
    Hp = _round_up(H, 128)
    Ap = _round_up(A, 128)

    def pad2(m, rows, cols):
        r, c = m.shape
        return jnp.pad(m, ((0, rows - r), (0, cols - c)))

    def pad1(v, n):
        return jnp.pad(v, (0, n - v.shape[0]))

    wh = jnp.concatenate([pad2(mean_w, Hp, Ap), pad2(lstd_w, Hp, Ap)], axis=1)
    bh = jnp.concatenate([pad1(params["mean_b"], Ap),
                          pad1(params["log_std_b"], Ap)])
    lo = jnp.concatenate([jnp.full((Ap,), -jnp.inf, jnp.float32),
                          jnp.full((Ap,), LOG_STD_MIN, jnp.float32)])
    hi = jnp.concatenate([jnp.full((Ap,), jnp.inf, jnp.float32),
                          jnp.full((Ap,), LOG_STD_MAX, jnp.float32)])
    return {
        "w1": pad2(w1, S, Hp).astype(jnp.bfloat16),
        "b1": pad1(params["b1"], Hp).reshape(1, Hp).astype(jnp.float32),
        "w2": pad2(w2, Hp, Hp).astype(jnp.bfloat16),
        "b2": pad1(params["b2"], Hp).reshape(1, Hp).astype(jnp.float32),
        "wh": wh.astype(jnp.bfloat16),          # (Hp, 2*Ap)
        "bh": bh.reshape(1, 2 * Ap).astype(jnp.float32),
        "lo": lo.reshape(1, 2 * Ap),
        "hi": hi.reshape(1, 2 * Ap),
    }


@functools.partial(jax.jit, static_argnames=("action_dim",))
def gaussian_policy_forward(state, prepped, *, action_dim):
    """Fused GaussianPolicy forward.

    state:      (B, state_dim) float32
    prepped:    output of prepare_params(...)
    action_dim: static int (true, un-padded action dim)
    returns:    (mean, log_std), each (B, action_dim) float32
    """
    B, S = state.shape
    Hp = prepped["w1"].shape[1]
    A2p = prepped["wh"].shape[1]
    Ap = A2p // 2
    A = action_dim

    TB = _choose_batch_tile(B)
    grid = (pl.cdiv(B, TB),)

    flops = 2 * B * (S * Hp + Hp * Hp + Hp * A2p)
    bytes_accessed = (
        B * S * 4
        + sum(int(v.size) * v.dtype.itemsize for v in prepped.values())
        + B * A2p * 4
    )

    out = pl.pallas_call(
        gaussian_policy_kernel,
        out_shape=jax.ShapeDtypeStruct((B, A2p), jnp.float32),
        grid=grid,
        in_specs=[
            pl.BlockSpec((TB, S), lambda i: (i, 0)),     # state tile (pipelined)
            pl.BlockSpec((S, Hp), lambda i: (0, 0)),     # weights: VMEM-resident
            pl.BlockSpec((1, Hp), lambda i: (0, 0)),
            pl.BlockSpec((Hp, Hp), lambda i: (0, 0)),
            pl.BlockSpec((1, Hp), lambda i: (0, 0)),
            pl.BlockSpec((Hp, A2p), lambda i: (0, 0)),
            pl.BlockSpec((1, A2p), lambda i: (0, 0)),
            pl.BlockSpec((1, A2p), lambda i: (0, 0)),
            pl.BlockSpec((1, A2p), lambda i: (0, 0)),
        ],
        out_specs=pl.BlockSpec((TB, A2p), lambda i: (i, 0)),
        compiler_params=pltpu.CompilerParams(
            dimension_semantics=("parallel",),  # shard batch loop across TCs (v7x)
        ),
        cost_estimate=pl.CostEstimate(
            flops=flops, transcendentals=0, bytes_accessed=bytes_accessed),
    )(state, prepped["w1"], prepped["b1"], prepped["w2"], prepped["b2"],
      prepped["wh"], prepped["bh"], prepped["lo"], prepped["hi"])

    mean = out[:, :A]
    log_std = out[:, Ap:Ap + A]   # log_std half starts at lane-aligned column Ap
    return mean, log_std


def init_params(key, state_dim, action_dim, hidden_dim, init_w=0.003):
    """Parameter init matching the PyTorch module (weights are (out, in))."""
    ks = jax.random.split(key, 8)

    def uniform(k, shape, bound):
        return jax.random.uniform(
            k, shape, minval=-bound, maxval=bound, dtype=jnp.float32
        )

    bound1 = 1.0 / float(jnp.sqrt(jnp.float32(state_dim)))
    bound2 = 1.0 / float(jnp.sqrt(jnp.float32(hidden_dim)))
    return {
        "w1": uniform(ks[0], (hidden_dim, state_dim), bound1),
        "b1": uniform(ks[1], (hidden_dim,), bound1),
        "w2": uniform(ks[2], (hidden_dim, hidden_dim), bound2),
        "b2": uniform(ks[3], (hidden_dim,), bound2),
        "mean_w": uniform(ks[4], (action_dim, hidden_dim), init_w),
        "mean_b": uniform(ks[5], (action_dim,), init_w),
        "log_std_w": uniform(ks[6], (action_dim, hidden_dim), init_w),
        "log_std_b": uniform(ks[7], (action_dim,), init_w),
    }


def reference_forward_f32(state, params):
    """Pure-JAX f32 reference mirroring the PyTorch forward()."""
    h1 = jnp.maximum(state @ params["w1"].T + params["b1"], 0.0)
    h2 = jnp.maximum(h1 @ params["w2"].T + params["b2"], 0.0)
    mean = h2 @ params["mean_w"].T + params["mean_b"]
    log_std = h2 @ params["log_std_w"].T + params["log_std_b"]
    log_std = jnp.clip(log_std, LOG_STD_MIN, LOG_STD_MAX)
    return mean, log_std


def reference_forward_bf16(state, params):
    """Reference with the same bf16-in / f32-accumulate matmul precision
    as the kernel (tight-tolerance check of the implementation)."""
    bf = jnp.bfloat16

    def mm(a, w_t):
        return jnp.dot(a.astype(bf), w_t.astype(bf),
                       preferred_element_type=jnp.float32)

    h1 = jnp.maximum(mm(state, params["w1"].T) + params["b1"], 0.0)
    h2 = jnp.maximum(mm(h1, params["w2"].T) + params["b2"], 0.0)
    mean = mm(h2, params["mean_w"].T) + params["mean_b"]
    log_std = mm(h2, params["log_std_w"].T) + params["log_std_b"]
    log_std = jnp.clip(log_std, LOG_STD_MIN, LOG_STD_MAX)
    return mean, log_std


if __name__ == "__main__":
    # Small shapes consistent with the module: state MLP, two heads.
    batch = 8
    state_dim = 16
    action_dim = 8
    hidden_dim = 32

    key = jax.random.PRNGKey(0)
    k_params, k_state = jax.random.split(key)
    params = init_params(k_params, state_dim, action_dim, hidden_dim)
    state = jax.random.normal(k_state, (batch, state_dim), dtype=jnp.float32)

    prepped = prepare_params(params)  # one-time layout / padding / dtype prep

    mean, log_std = gaussian_policy_forward(state, prepped, action_dim=action_dim)
    mean = jax.block_until_ready(mean)
    log_std = jax.block_until_ready(log_std)

    # Check against a reference with matching (bf16-in, f32-acc) matmuls.
    ref_mean, ref_log_std = reference_forward_bf16(state, params)
    assert jnp.allclose(mean, ref_mean, atol=1e-2, rtol=1e-2)
    assert jnp.allclose(log_std, ref_log_std, atol=1e-2, rtol=1e-2)

    # Loose check against the pure-f32 PyTorch-equivalent reference.
    f32_mean, f32_log_std = reference_forward_f32(state, params)
    assert jnp.allclose(mean, f32_mean, atol=5e-2, rtol=5e-2)
    assert jnp.allclose(log_std, f32_log_std, atol=5e-2, rtol=5e-2)

    assert mean.shape == (batch, action_dim)
    assert log_std.shape == (batch, action_dim)

    # TODO(synk): sample() (rsample + tanh squash + log_prob) is stochastic
    # glue around forward(); only the deterministic forward hot path is fused.
    print("KERNEL_OK")
</pallas_src>

<mosaic_0001>
module attributes {stable_mosaic.version = 11 : i64} {
  func.func @gaussian_policy_kernel(%arg0: i32, %arg1: memref<8x16xf32, #tpu.memory_space<vmem>>, %arg2: memref<16x128xbf16, #tpu.memory_space<vmem>>, %arg3: memref<1x128xf32, #tpu.memory_space<vmem>>, %arg4: memref<128x128xbf16, #tpu.memory_space<vmem>>, %arg5: memref<1x128xf32, #tpu.memory_space<vmem>>, %arg6: memref<128x256xbf16, #tpu.memory_space<vmem>>, %arg7: memref<1x256xf32, #tpu.memory_space<vmem>>, %arg8: memref<1x256xf32, #tpu.memory_space<vmem>>, %arg9: memref<1x256xf32, #tpu.memory_space<vmem>>, %arg10: memref<8x256xf32, #tpu.memory_space<vmem>>) attributes {dimension_semantics = [#tpu.dimension_semantics<parallel>], iteration_bounds = array<i64: 1>, scalar_prefetch = 0 : i64, scratch_operands = 0 : i64, tpu.core_type = #tpu.core_type<tc>, window_params = [{transform_indices = @transform_0, window_bounds = array<i64: 8, 16>}, {pipeline_mode = #tpu.pipeline_mode<synchronous>, transform_indices = @transform_1, window_bounds = array<i64: 16, 128>}, {pipeline_mode = #tpu.pipeline_mode<synchronous>, transform_indices = @transform_2, window_bounds = array<i64: 1, 128>}, {pipeline_mode = #tpu.pipeline_mode<synchronous>, transform_indices = @transform_3, window_bounds = array<i64: 128, 128>}, {pipeline_mode = #tpu.pipeline_mode<synchronous>, transform_indices = @transform_4, window_bounds = array<i64: 1, 128>}, {pipeline_mode = #tpu.pipeline_mode<synchronous>, transform_indices = @transform_5, window_bounds = array<i64: 128, 256>}, {pipeline_mode = #tpu.pipeline_mode<synchronous>, transform_indices = @transform_6, window_bounds = array<i64: 1, 256>}, {pipeline_mode = #tpu.pipeline_mode<synchronous>, transform_indices = @transform_7, window_bounds = array<i64: 1, 256>}, {pipeline_mode = #tpu.pipeline_mode<synchronous>, transform_indices = @transform_8, window_bounds = array<i64: 1, 256>}, {transform_indices = @transform_9, window_bounds = array<i64: 8, 256>}]} {
    %c0 = arith.constant 0 : index
    %c0_0 = arith.constant 0 : index
    %0 = vector.load %arg1[%c0, %c0_0] : memref<8x16xf32, #tpu.memory_space<vmem>>, vector<8x16xf32>
    %1 = arith.truncf %0 : vector<8x16xf32> to vector<8x16xbf16>
    %c0_1 = arith.constant 0 : index
    %c0_2 = arith.constant 0 : index
    %2 = vector.load %arg2[%c0_1, %c0_2] : memref<16x128xbf16, #tpu.memory_space<vmem>>, vector<16x128xbf16>
    %cst = arith.constant dense<0.000000e+00> : vector<8x128xf32>
    %3 = tpu.matmul %1, %2, %cst {dimension_numbers = #tpu.dot_dimension_numbers<[1], [0], [0], [1], [0, 0, 1, 1], [], []>} : vector<8x16xbf16>, vector<16x128xbf16>, vector<8x128xf32> -> vector<8x128xf32>
    %c0_3 = arith.constant 0 : index
    %c0_4 = arith.constant 0 : index
    %4 = vector.load %arg3[%c0_3, %c0_4] : memref<1x128xf32, #tpu.memory_space<vmem>>, vector<1x128xf32>
    %5 = vector.broadcast %4 : vector<1x128xf32> to vector<8x128xf32>
    %6 = arith.addf %3, %5 : vector<8x128xf32>
    %cst_5 = arith.constant 0.000000e+00 : f32
    %7 = vector.broadcast %cst_5 : f32 to vector<8x128xf32>
    %8 = arith.maximumf %6, %7 : vector<8x128xf32>
    %9 = arith.truncf %8 : vector<8x128xf32> to vector<8x128xbf16>
    %c0_6 = arith.constant 0 : index
    %c0_7 = arith.constant 0 : index
    %10 = vector.load %arg4[%c0_6, %c0_7] : memref<128x128xbf16, #tpu.memory_space<vmem>>, vector<128x128xbf16>
    %cst_8 = arith.constant dense<0.000000e+00> : vector<8x128xf32>
    %11 = tpu.matmul %9, %10, %cst_8 {dimension_numbers = #tpu.dot_dimension_numbers<[1], [0], [0], [1], [0, 0, 1, 1], [], []>} : vector<8x128xbf16>, vector<128x128xbf16>, vector<8x128xf32> -> vector<8x128xf32>
    %c0_9 = arith.constant 0 : index
    %c0_10 = arith.constant 0 : index
    %12 = vector.load %arg5[%c0_9, %c0_10] : memref<1x128xf32, #tpu.memory_space<vmem>>, vector<1x128xf32>
    %13 = vector.broadcast %12 : vector<1x128xf32> to vector<8x128xf32>
    %14 = arith.addf %11, %13 : vector<8x128xf32>
    %cst_11 = arith.constant 0.000000e+00 : f32
    %15 = vector.broadcast %cst_11 : f32 to vector<8x128xf32>
    %16 = arith.maximumf %14, %15 : vector<8x128xf32>
    %17 = arith.truncf %16 : vector<8x128xf32> to vector<8x128xbf16>
    %c0_12 = arith.constant 0 : index
    %c0_13 = arith.constant 0 : index
    %18 = vector.load %arg6[%c0_12, %c0_13] : memref<128x256xbf16, #tpu.memory_space<vmem>>, vector<128x256xbf16>
    %cst_14 = arith.constant dense<0.000000e+00> : vector<8x256xf32>
    %19 = tpu.matmul %17, %18, %cst_14 {dimension_numbers = #tpu.dot_dimension_numbers<[1], [0], [0], [1], [0, 0, 1, 1], [], []>} : vector<8x128xbf16>, vector<128x256xbf16>, vector<8x256xf32> -> vector<8x256xf32>
    %c0_15 = arith.constant 0 : index
    %c0_16 = arith.constant 0 : index
    %20 = vector.load %arg7[%c0_15, %c0_16] : memref<1x256xf32, #tpu.memory_space<vmem>>, vector<1x256xf32>
    %21 = vector.broadcast %20 : vector<1x256xf32> to vector<8x256xf32>
    %22 = arith.addf %19, %21 : vector<8x256xf32>
    %c0_17 = arith.constant 0 : index
    %c0_18 = arith.constant 0 : index
    %23 = vector.load %arg8[%c0_17, %c0_18] : memref<1x256xf32, #tpu.memory_space<vmem>>, vector<1x256xf32>
    %24 = vector.broadcast %23 : vector<1x256xf32> to vector<8x256xf32>
    %25 = arith.maximumf %22, %24 : vector<8x256xf32>
    %c0_19 = arith.constant 0 : index
    %c0_20 = arith.constant 0 : index
    %26 = vector.load %arg9[%c0_19, %c0_20] : memref<1x256xf32, #tpu.memory_space<vmem>>, vector<1x256xf32>
    %27 = vector.broadcast %26 : vector<1x256xf32> to vector<8x256xf32>
    %28 = arith.minimumf %25, %27 : vector<8x256xf32>
    %c0_21 = arith.constant 0 : index
    %c0_22 = arith.constant 0 : index
    %29 = vector.load %arg10[%c0_21, %c0_22] : memref<8x256xf32, #tpu.memory_space<vmem>>, vector<8x256xf32>
    tpu.vector_store %arg10[%c0_21, %c0_22], %28 {strides = array<i32>} : memref<8x256xf32, #tpu.memory_space<vmem>>, vector<8x256xf32>,
    return
  }
  func.func @transform_0(%arg0: i32) -> (i32, i32) {
    %c0_i32 = arith.constant 0 : i32
    %c0_i32_0 = arith.constant 0 : i32
    return %arg0, %c0_i32 : i32, i32
  }
  func.func @transform_1(%arg0: i32) -> (i32, i32) {
    %c0_i32 = arith.constant 0 : i32
    %c0_i32_0 = arith.constant 0 : i32
    %c0_i32_1 = arith.constant 0 : i32
    return %c0_i32, %c0_i32_0 : i32, i32
  }
  func.func @transform_2(%arg0: i32) -> (i32, i32) {
    %c0_i32 = arith.constant 0 : i32
    %c0_i32_0 = arith.constant 0 : i32
    %c0_i32_1 = arith.constant 0 : i32
    return %c0_i32, %c0_i32_0 : i32, i32
  }
  func.func @transform_3(%arg0: i32) -> (i32, i32) {
    %c0_i32 = arith.constant 0 : i32
    %c0_i32_0 = arith.constant 0 : i32
    %c0_i32_1 = arith.constant 0 : i32
    return %c0_i32, %c0_i32_0 : i32, i32
  }
  func.func @transform_4(%arg0: i32) -> (i32, i32) {
    %c0_i32 = arith.constant 0 : i32
    %c0_i32_0 = arith.constant 0 : i32
    %c0_i32_1 = arith.constant 0 : i32
    return %c0_i32, %c0_i32_0 : i32, i32
  }
  func.func @transform_5(%arg0: i32) -> (i32, i32) {
    %c0_i32 = arith.constant 0 : i32
    %c0_i32_0 = arith.constant 0 : i32
    %c0_i32_1 = arith.constant 0 : i32
    return %c0_i32, %c0_i32_0 : i32, i32
  }
  func.func @transform_6(%arg0: i32) -> (i32, i32) {
    %c0_i32 = arith.constant 0 : i32
    %c0_i32_0 = arith.constant 0 : i32
    %c0_i32_1 = arith.constant 0 : i32
    return %c0_i32, %c0_i32_0 : i32, i32
  }
  func.func @transform_7(%arg0: i32) -> (i32, i32) {
    %c0_i32 = arith.constant 0 : i32
    %c0_i32_0 = arith.constant 0 : i32
    %c0_i32_1 = arith.constant 0 : i32
    return %c0_i32, %c0_i32_0 : i32, i32
  }
  func.func @transform_8(%arg0: i32) -> (i32, i32) {
    %c0_i32 = arith.constant 0 : i32
    %c0_i32_0 = arith.constant 0 : i32
    %c0_i32_1 = arith.constant 0 : i32
    return %c0_i32, %c0_i32_0 : i32, i32
  }
  func.func @transform_9(%arg0: i32) -> (i32, i32) {
    %c0_i32 = arith.constant 0 : i32
    %c0_i32_0 = arith.constant 0 : i32
    return %arg0, %c0_i32 : i32, i32
  }
}

</mosaic_0001>

<bundles_post_ra>
// kernel: gaussian_policy_forward.1
= control target key start
LH: loop header
LB: loop body
LE: loop exit
PB: predicated region body
PF: predicated region fallthrough
CT: control target
= control target key end

     0   :  { %14 = vsyncpa [#allocation3], 0  ;;  %s838_s0 = inlined_call_operand.hbm [shape: f32[8,16], index: 0, kind: input, shape index: {}]   ;;  %s839_s1 = inlined_call_operand.vmem [shape: bf16[16,128], index: 1, kind: input, shape index: {}]   ;;  %s840_s2 = inlined_call_operand.hbm [shape: f32[1,128], index: 2, kind: input, shape index: {}]   ;;  %s841_s3 = inlined_call_operand.hbm [shape: bf16[128,128], index: 3, kind: input, shape index: {}]   ;;  %s842_s4 = inlined_call_operand.hbm [shape: f32[1,128], index: 4, kind: input, shape index: {}]   ;;  %s843_s5 = inlined_call_operand.hbm [shape: bf16[128,256], index: 5, kind: input, shape index: {}]   ;;  %s844_s6 = inlined_call_operand.vmem [shape: f32[1,256], index: 6, kind: input, shape index: {}]   ;;  %s845_s7 = inlined_call_operand.hbm [shape: f32[1,256], index: 7, kind: input, shape index: {}]   ;;  %s846_s8 = inlined_call_operand.hbm [shape: f32[1,256], index: 8, kind: input, shape index: {}]   ;;  %s847_s9 = inlined_call_operand.vmem [shape: f32[8,256], index: 9, kind: output, shape index: {}]  }
   0x1   :  { %15 = vsyncpa [#allocation5], 0 }
   0x2   :  { %16 = vsyncpa [#allocation8], 0 }
   0x3   :  { %17 = vsyncpa [#allocation11], 0  ;;  %s741_s30 = smov [#allocation4]   ;;  %s742_s11 = smov [#allocation7]  }
   0x4   :  { %s36_s10 = sshll.u32 %s741_s30, 4  ;;  %s58_s12 = sshll.u32 %s742_s11, 4  ;;  %s37_s10 = int_to_ptr.vmem [resolvable:$true] %s36_s10  ;;  %s59_s12 = int_to_ptr.vmem [resolvable:$true] %s58_s12 }
   0x5   :  { %s601_s13 = scalar_lea.vmem %s37_s10, 16  ;;  %s605_s14 = scalar_lea.vmem %s37_s10, 32 }
   0x6   :  { %p602_p0 = scmp.ne.s32.totalorder %s37_s10, %s601_s13  ;;  %p606_p1 = scmp.lt.s32.totalorder %s37_s10, %s37_s10 }
   0x7   :  { %p607_p2 = scmp.lt.s32.totalorder %s605_s14, %s601_s13 }
   0x9   :  { %p608_p3 = por %p607_p2, %p606_p1 }
   0xb   :  { %p609_p4 = pnand %p608_p3, %p602_p0 }
   0xd   :  { %612 = shalt.err (!%p609_p4)
}
   0xe   :  { %39 = dma.hbm_to_vmem [thread:$0]  %s840_s2, 16, %s37_s10, [#allocation5]  }
   0xf   :  { %s621_s17 = scalar_lea.vmem %s59_s12, 16  ;;  %s625_s18 = scalar_lea.vmem %s59_s12, 32 }
  0x10   :  { %p622_p5 = scmp.ne.s32.totalorder %s59_s12, %s621_s17  ;;  %p626_p6 = scmp.lt.s32.totalorder %s59_s12, %s59_s12 }
  0x11   :  { %p627_p7 = scmp.lt.s32.totalorder %s625_s18, %s621_s17 }
  0x13   :  { %p628_p8 = por %p627_p7, %p626_p6 }
  0x15   :  { %p629_p9 = pnand %p628_p8, %p622_p5 }
  0x17   :  { %632 = shalt.err (!%p629_p9)
}
  0x18   :  { %61 = dma.hbm_to_vmem [thread:$0]  %s842_s4, 16, %s59_s12, [#allocation8]  }
  0x19   :  { %s743_s21 = smov [#allocation10]   ;;  %s744_s23 = smov [#allocation2]  }
  0x1a   :  { %s82_s22 = sshll.u32 %s743_s21, 4  ;;  %s24_s24 = sshll.u32 %s744_s23, 4  ;;  %s83_s22 = int_to_ptr.vmem [resolvable:$true] %s82_s22  ;;  %s25_s24 = int_to_ptr.vmem [resolvable:$true] %s24_s24 }
  0x1b   :  { %s641_s25 = scalar_lea.vmem %s83_s22, 32  ;;  %p646_p11 = scmp.lt.s32.totalorder %s83_s22, %s83_s22 }
  0x1c   :  { %p642_p10 = scmp.ne.s32.totalorder %s83_s22, %s641_s25  ;;  %p647_p12 = scmp.lt.s32.totalorder %s641_s25, %s641_s25 }
  0x1e   :  { %p648_p13 = por %p647_p12, %p646_p11 }
  0x20   :  { %p649_p0 = pnand %p648_p13, %p642_p10 }
  0x22   :  { %652 = shalt.err (!%p649_p0)
}
  0x23   :  { %85 = dma.hbm_to_vmem [thread:$0]  %s845_s7, 32, %s83_s22, [#allocation11]  }
  0x24   :  { %s661_s27 = scalar_lea.vmem %s25_s24, 128  ;;  %p666_p2 = scmp.lt.s32.totalorder %s25_s24, %s25_s24 }
  0x25   :  { %p662_p1 = scmp.ne.s32.totalorder %s25_s24, %s661_s27  ;;  %p667_p3 = scmp.lt.s32.totalorder %s661_s27, %s661_s27 }
  0x27   :  { %p668_p4 = por %p667_p3, %p666_p2 }
  0x29   :  { %p669_p5 = pnand %p668_p4, %p662_p1 }
  0x2b   :  { %672 = shalt.err (!%p669_p5)
}
  0x2c   :  { %27 = dma.hbm_to_vmem [thread:$0]  %s838_s0, 128, %s25_s24, [#allocation3]  }
  0x2d   :  { %s745_s29 = smov [#allocation6]  }
  0x2e   :  { %s45_s30 = sshll.u32 %s745_s29, 4  ;;  %s46_s30 = int_to_ptr.vmem [resolvable:$true] %s45_s30 }
  0x2f   :  { %s681_s10 = scalar_lea.vmem %s46_s30, 1024  ;;  %p686_p7 = scmp.lt.s32.totalorder %s46_s30, %s46_s30 }
  0x30   :  { %p682_p6 = scmp.ne.s32.totalorder %s46_s30, %s681_s10  ;;  %p687_p8 = scmp.lt.s32.totalorder %s681_s10, %s681_s10 }
  0x32   :  { %p688_p9 = por %p687_p8, %p686_p7 }
  0x34   :  { %p689_p10 = pnand %p688_p9, %p682_p6 }
  0x36   :  { %692 = shalt.err (!%p689_p10)
}
  0x37   :  { %s746_s7 = smov 64   ;;  %s747_s11 = smov 4  }
  0x38   :  { %51 = dma.hbm_to_vmem [thread:$0]  %s841_s3, 1024, %s46_s30, [#allocation5], %s746_s7, %s746_s7, %s747_s11  }
  0x39   :  { %s748_s14 = smov [#allocation9]  }
  0x3a   :  { %s67_s15 = sshll.u32 %s748_s14, 4  ;;  %s68_s15 = int_to_ptr.vmem [resolvable:$true] %s67_s15 }
  0x3b   :  { %s701_s0 = scalar_lea.vmem %s68_s15, 2048  ;;  %p706_p12 = scmp.lt.s32.totalorder %s68_s15, %s68_s15 }
  0x3c   :  { %p702_p11 = scmp.ne.s32.totalorder %s68_s15, %s701_s0  ;;  %p707_p13 = scmp.lt.s32.totalorder %s701_s0, %s701_s0 }
  0x3e   :  { %p708_p0 = por %p707_p13, %p706_p12 }
  0x40   :  { %p709_p1 = pnand %p708_p0, %p702_p11 }
  0x42   :  { %712 = shalt.err (!%p709_p1)
}
  0x43   :  { %s749_s16 = smov 128   ;;  %s750_s17 = smov 8  }
  0x44   :  { %73 = dma.hbm_to_vmem [thread:$0]  %s843_s5, 2048, %s68_s15, [#allocation8], %s749_s16, %s749_s16, %s750_s17  }
  0x45   :  { %s751_s20 = smov [#allocation12]  }
  0x46   :  { %s92_s21 = sshll.u32 %s751_s20, 4  ;;  %s93_s21 = int_to_ptr.vmem [resolvable:$true] %s92_s21 }
  0x47   :  { %s721_s3 = scalar_lea.vmem %s93_s21, 32  ;;  %p726_p3 = scmp.lt.s32.totalorder %s93_s21, %s93_s21 }
  0x48   :  { %p722_p2 = scmp.ne.s32.totalorder %s93_s21, %s721_s3  ;;  %p727_p4 = scmp.lt.s32.totalorder %s721_s3, %s721_s3 }
  0x4a   :  { %p728_p5 = por %p727_p4, %p726_p3 }
  0x4c   :  { %p729_p6 = pnand %p728_p5, %p722_p2 }
  0x4e   :  { %732 = shalt.err (!%p729_p6)
}
  0x4f   :  { %95 = dma.hbm_to_vmem [thread:$0]  %s846_s8, 32, %s93_s21, [#allocation11]  }
  0x50   :  { %733 = dma.done.wait [#allocation3], 128  }
  0x51   :  { %734 = vsyncadd [#allocation3], 4294967168 }
  0x52   :  { %735 = dma.done.wait [#allocation5], 1040  }
  0x53   :  { %736 = vsyncadd [#allocation5], 4294966256 }
  0x54   :  { %737 = dma.done.wait [#allocation8], 2064  }
  0x55   :  { %738 = vsyncadd [#allocation8], 4294965232 }
  0x56   :  { %739 = dma.done.wait [#allocation11], 64  }
  0x57   :  { %740 = vsyncadd [#allocation11], 4294967232  ;;  %v752_v0 = vmov 0.0   ;;  %vm753_vm0 = vmmov 0   ;;  %v560_v1 = vld [vmem:[%s839_s1] sm:$0xff]   ;;  %vm135_vm1 = vcmask 130048   ;;  %v312_v45 = vlaneseq }
  0x58   :  { %520 = vmatprep.subr.bf16.mxu0 %v752_v0  ;;  %522 = vmatprep.mubr.msk.bf16.mxu0 %vm753_vm0, %v752_v0  ;;  %v118_v2 = vld [vmem:[#allocation2] sm:$0xff]  ;;  %v563_v6 = vld [vmem:[#allocation6 + $0x28] sm:$0xff]   ;;  %v564_v7 = vld [vmem:[#allocation6 + $0x20] sm:$0xff]   ;;  %v754_v36 = vmov 0  }
  0x59   :  { %526 = vmatprep.subr.bf16.mxu1 %v752_v0  ;;  %542 = vmatprep.mubr.msk.bf16.mxu1 %vm753_vm0, %v752_v0  ;;  %v119_v3 = vpack.c.bf16 %v118_v2, %v118_v2  ;;  %v561_v4 = vld [vmem:[#allocation6 + $0x38] sm:$0xff]   ;;  %v562_v5 = vld [vmem:[#allocation6 + $0x30] sm:$0xff]   ;;  %v567_v10 = vld [vmem:[#allocation6 + $0x8] sm:$0xff]   ;;  %v313_v46 = vshrl.u32 %v312_v45, 7 }
  0x5a   :  { %521 = vmatpush3.bf16.msra.mxu0 %v560_v1  ;;  %527 = vmatpush3.bf16.msra.mxu1 %v561_v4  ;;  %v565_v8 = vld [vmem:[#allocation6 + $0x18] sm:$0xff]   ;;  %v566_v9 = vld [vmem:[#allocation6 + $0x10] sm:$0xff]   ;;  %v568_v11 = vld [vmem:[#allocation6] sm:$0xff]  }
  0x5b   :  { %528 = vmatprep.subr.bf16.mxu1 %v752_v0  ;;  %v569_v12 = vld [vmem:[#allocation9 + $0x70] ss:$8 sps:$4 sm:$0xff]   ;;  %v571_v13 = vld [vmem:[#allocation9 + $0x74] ss:$8 sps:$4 sm:$0xff]   ;;  %v574_v14 = vld [vmem:[#allocation9 + $0x64] ss:$8 sps:$4 sm:$0xff]  }
  0x5c   :  { %402 = vmatprep.subr.bf16.mxu0 %v571_v13  ;;  %v572_v15 = vld [vmem:[#allocation9 + $0x60] ss:$8 sps:$4 sm:$0xff]   ;;  %v577_v16 = vld [vmem:[#allocation9 + $0x54] ss:$8 sps:$4 sm:$0xff]   ;;  %v575_v17 = vld [vmem:[#allocation9 + $0x50] ss:$8 sps:$4 sm:$0xff]  }
  0x5d   :  { %523 = vmatmul.mubr.msk.bf16.vlgmr.msra.gmra.mxu0 %vm135_vm1, %v119_v3  ;;  %v580_v18 = vld [vmem:[#allocation9 + $0x44] ss:$8 sps:$4 sm:$0xff]   ;;  %v578_v19 = vld [vmem:[#allocation9 + $0x40] ss:$8 sps:$4 sm:$0xff]   ;;  %v583_v20 = vld [vmem:[#allocation9 + $0x34] ss:$8 sps:$4 sm:$0xff]  }
  0x5e   :  { %529 = vmatpush3.bf16.msra.mxu1 %v562_v5  ;;  %403 = vmatpush1.bf16.msra.mxu0 %v569_v12  ;;  %v581_v21 = vld [vmem:[#allocation9 + $0x30] ss:$8 sps:$4 sm:$0xff]   ;;  %v586_v22 = vld [vmem:[#allocation9 + $0x24] ss:$8 sps:$4 sm:$0xff]   ;;  %v584_v23 = vld [vmem:[#allocation9 + $0x20] ss:$8 sps:$4 sm:$0xff]  }
  0x5f   :  { %530 = vmatprep.subr.bf16.mxu1 %v752_v0  ;;  %404 = vmatprep.subr.bf16.mxu0 %v574_v14  ;;  %v589_v24 = vld [vmem:[#allocation9 + $0x14] ss:$8 sps:$4 sm:$0xff]   ;;  %v587_v25 = vld [vmem:[#allocation9 + $0x10] ss:$8 sps:$4 sm:$0xff]   ;;  %v592_v34 = vld [vmem:[#allocation9 + $0x4] ss:$8 sps:$4 sm:$0xff]  }
  0x60   :  { %v481_v26 = vld [vmem:[#allocation4] ss:$0 sm:$0xff]  ;;  %v590_v35 = vld [vmem:[#allocation9] ss:$8 sps:$4 sm:$0xff]   ;;  %434 = vmatprep.mubr.bf16.mxu0 %v754_v36  ;;  %v484_v37 = vld [vmem:[#allocation7] ss:$0 sm:$0xff] }
  0x61   :  { %v314_v47 = vsub.s32 0, %v313_v46  ;;  %v310_v48 = vld [vmem:[%s844_s6] sm:$0x3]  ;;  %v318_v49 = vsub.s32 1, %v313_v46  ;;  %v443_v50 = vld [vmem:[#allocation10] sm:$0x3] }
  0x62   :  { %531 = vmatpush3.bf16.msra.mxu1 %v563_v6  ;;  %405 = vmatpush1.bf16.msra.mxu0 %v572_v15  ;;  %v457_v52 = vld [vmem:[#allocation12] sm:$0x3] }
  0x63   :  { %532 = vmatprep.subr.bf16.mxu1 %v752_v0  ;;  %406 = vmatprep.subr.bf16.mxu0 %v577_v16  ;;  %v315_v51 = vrot.slane %v310_v48, %v314_v47  ;;  %v448_v53 = vrot.slane %v443_v50, %v314_v47  ;;  %v319_v54 = vrot.slane %v310_v48, %v318_v49 }
  0x64   :  { %v462_v57 = vrot.slane %v457_v52, %v314_v47  ;;  %v452_v58 = vrot.slane %v443_v50, %v318_v49  ;;  %v466_v62 = vrot.slane %v457_v52, %v318_v49 }
  0x66   :  { %533 = vmatpush3.bf16.msra.mxu1 %v564_v7  ;;  %407 = vmatpush1.bf16.msra.mxu0 %v575_v17 }
  0x67   :  { %534 = vmatprep.subr.bf16.mxu1 %v752_v0  ;;  %408 = vmatprep.subr.bf16.mxu0 %v580_v18 }
  0x6a   :  { %535 = vmatpush3.bf16.msra.mxu1 %v565_v8  ;;  %409 = vmatpush1.bf16.msra.mxu0 %v578_v19 }
  0x6b   :  { %536 = vmatprep.subr.bf16.mxu1 %v752_v0  ;;  %410 = vmatprep.subr.bf16.mxu0 %v583_v20 }
  0x6e   :  { %537 = vmatpush3.bf16.msra.mxu1 %v566_v9  ;;  %411 = vmatpush1.bf16.msra.mxu0 %v581_v21 }
  0x6f   :  { %538 = vmatprep.subr.bf16.mxu1 %v752_v0  ;;  %412 = vmatprep.subr.bf16.mxu0 %v586_v22 }
  0x72   :  { %539 = vmatpush3.bf16.msra.mxu1 %v567_v10  ;;  %413 = vmatpush1.bf16.msra.mxu0 %v584_v23 }
  0x73   :  { %540 = vmatprep.subr.bf16.mxu1 %v752_v0  ;;  %414 = vmatprep.subr.bf16.mxu0 %v589_v24 }
  0x76   :  { %541 = vmatpush3.bf16.msra.mxu1 %v568_v11  ;;  %415 = vmatpush1.bf16.msra.mxu0 %v587_v25 }
  0x77   :  { %416 = vmatprep.subr.bf16.mxu0 %v592_v34 }
  0x7a   :  { %417 = vmatpush1.bf16.msra.mxu0 %v590_v35 }
 0x11d   :  { %v173_v27 = vpop.f32.mrf.mxu0 }
 0x11e   :  { %v174_v28 = vadd.f32 %v481_v26, %v173_v27 }
 0x11f   :  { %v524_v29 = vpop.f32.mrf.mxu0 }
 0x120   :  { %v179_v30 = vmax.f32 %v174_v28, 0.0 }
 0x121   :  { %v176_v31 = vpop.f32.mrf.mxu0 }
 0x122   :  { %v180_v32 = vpack.c.bf16 %v179_v30, %v179_v30 }
 0x123   :  { %v525_v33 = vpop.f32.mrf.mxu0 }
 0x124   :  { %543 = vmatmul.mubr.bf16.vlgmr.msra.gmra.mxu1 %v180_v32 }
 0x1e4   :  { %v286_v38 = vpop.f32.mrf.mxu1 }
 0x1e5   :  { %v287_v39 = vadd.f32 %v484_v37, %v286_v38 }
 0x1e6   :  { %v544_v40 = vpop.f32.mrf.mxu1 }
 0x1e7   :  { %v292_v41 = vmax.f32 %v287_v39, 0.0 }
 0x1e8   :  { %v289_v42 = vpop.f32.mrf.mxu1 }
 0x1e9   :  { %v293_v43 = vpack.c.bf16 %v292_v41, %v292_v41 }
 0x1ea   :  { %v545_v44 = vpop.f32.mrf.mxu1 }
 0x1eb   :  { %435 = vmatmul.mubr.bf16.vlgmr.msra.gmra.mxu0 %v293_v43 }
 0x2ab   :  { %v436_v55 = vpop.f32.mrf.mxu0 }
 0x2ac   :  { %v437_v56 = vadd.f32 %v436_v55, %v315_v51 }
 0x2ad   :  { %v438_v59 = vpop.f32.mrf.mxu0 }
 0x2ae   :  { %v455_v60 = vmax.f32 %v437_v56, %v448_v53  ;;  %v439_v61 = vadd.f32 %v438_v59, %v319_v54 }
 0x2af   :  { %v440_v63 = vpop.f32.mrf.mxu0 }
 0x2b0   :  { %v469_v0 = vmin.f32 %v455_v60, %v462_v57  ;;  %v456_v1 = vmax.f32 %v439_v61, %v452_v58 }
 0x2b1   :  { %v441_v2 = vpop.f32.mrf.mxu0 }
 0x2b2   :  { %471 = vst [vmem:[%s847_s9] sm:$0xff] %v469_v0  ;;  %v470_v3 = vmin.f32 %v456_v1, %v466_v62 }
 0x2b4   :  { %472 = vst [vmem:[%s847_s9 + $0x8] sm:$0xff] %v470_v3 }
 0x2b5   :  { %477 = vsyncpa [#allocation3], 1 }
 0x2b6   :  { %478 = vsyncpa [#allocation5], 1 }
 0x2b7   :  { %479 = vsyncpa [#allocation8], 1 }
 0x2b8   :  { %480 = vsyncpa [#allocation11], 1 }

</bundles_post_ra>
